<compile_context>
chip_gen: v7x
topology: tpu7x:2x2x1
jax: 0.10.0
libtpu: 0.0.40
codegen_flags: <defaults>
</compile_context>

<pallas_src>
import functools

import jax
import jax.numpy as jnp
from jax import lax
from jax.experimental import pallas as pl
from jax.experimental.pallas import tpu as pltpu


_MASK_VALUE = -1e30     # large finite negative (safe if scores ever go low-precision)


def _round_up(x, m):
    return ((x + m - 1) // m) * m


def _vmem_limit_bytes():
    """Generation-aware VMEM limit: ~3/4 of physical, capped at 100 MiB.

    v7x (64 MiB physical)  -> 48 MiB ; v5e/v6e (128 MiB) -> 96 MiB.
    Conservative 48 MiB fallback if the query is unavailable.
    """
    try:
        cap = int(pltpu.get_tpu_info().vmem_capacity_bytes)
        return max(32 * 1024 * 1024, min((cap * 3) // 4, 100 * 1024 * 1024))
    except Exception:
        return 48 * 1024 * 1024


def fuse_qkv_weights(wq, wk, wv, *, n_head, compute_dtype=jnp.bfloat16):
    """Build the fused (E, 3E) QKV weight ONCE (hoisted out of the per-call path).

    The 1/sqrt(head_dim) attention scale is folded into the Wq columns so the
    flash kernel never rescales q (and the bf16 path avoids an extra rounding).
    """
    e = wq.shape[0]
    d = e // n_head
    scale = 1.0 / (d ** 0.5)
    w = jnp.concatenate([wq.T * scale, wk.T, wv.T], axis=1)
    return w.astype(compute_dtype)


# --------------------------------------------------------------------------- #
# Kernel 1: fused QKV projection, head-major outputs                          #
# --------------------------------------------------------------------------- #
def _qkv_proj_kernel(x_ref, w_ref, q_ref, k_ref, v_ref, *, n_head, head_dim):
    # x_ref: (1, bt, E), w_ref: (E, 3E), q/k/v_ref: (1, H, bt, D)
    e = n_head * head_dim
    y = jnp.dot(x_ref[0], w_ref[...], preferred_element_type=jnp.float32)  # (bt, 3E)
    # Split per head directly into head-major outputs (no wrapper-side HBM relayout).
    for out_ref, base in ((q_ref, 0), (k_ref, e), (v_ref, 2 * e)):
        for hh in range(n_head):
            off = base + hh * head_dim
            out_ref[0, hh] = y[:, off:off + head_dim].astype(out_ref.dtype)


# --------------------------------------------------------------------------- #
# Kernel 2: flash attention (causal, online softmax, triangular schedule)     #
# --------------------------------------------------------------------------- #
def _flash_attn_kernel(qidx_ref, kidx_ref, q_ref, k_ref, v_ref, o_ref,
                       m_sc, l_sc, acc_sc, *, blk_q, blk_kv, n_kv):
    step = pl.program_id(2)
    qi = qidx_ref[step]          # q-tile index for this step (SMEM scalar)
    ki = kidx_ref[step]          # kv-tile index for this step

    @pl.when(ki == 0)
    def _init():
        m_sc[...] = jnp.full(m_sc.shape, -jnp.inf, dtype=m_sc.dtype)
        l_sc[...] = jnp.zeros(l_sc.shape, dtype=l_sc.dtype)
        acc_sc[...] = jnp.zeros(acc_sc.shape, dtype=acc_sc.dtype)

    def _process(apply_mask):
        q = q_ref[0, 0]          # (blk_q, D)  -- scale already folded into Wq
        k = k_ref[0, 0]          # (blk_kv, D)
        v = v_ref[0, 0]          # (blk_kv, D)

        # q @ k^T via contraction on the head dim (no explicit transpose), f32 accumulate
        s = lax.dot_general(q, k, (((1,), (1,)), ((), ())),
                            preferred_element_type=jnp.float32)   # (blk_q, blk_kv)

        if apply_mask:           # only tiles crossing the causal boundary
            row = qi * blk_q + lax.broadcasted_iota(jnp.int32, (blk_q, blk_kv), 0)
            col = ki * blk_kv + lax.broadcasted_iota(jnp.int32, (blk_q, blk_kv), 1)
            s = jnp.where(row >= col, s, _MASK_VALUE)

        m_prev = m_sc[...]
        m_new = jnp.maximum(m_prev, jnp.max(s, axis=-1, keepdims=True))
        alpha = jnp.exp(m_prev - m_new)
        p = jnp.exp(s - m_new)   # f32, unnormalized (normalization deferred)

        l_sc[...] = alpha * l_sc[...] + jnp.sum(p, axis=-1, keepdims=True)
        acc_sc[...] = alpha * acc_sc[...] + jnp.dot(
            p.astype(v.dtype), v, preferred_element_type=jnp.float32)
        m_sc[...] = m_new

    # The kv tile crosses the causal boundary iff its max column exceeds the
    # minimum query row of this q tile (valid for any blk_q / blk_kv combo).
    needs_mask = (ki + 1) * blk_kv - 1 > qi * blk_q

    @pl.when(jnp.logical_not(needs_mask))
    def _no_mask():
        _process(apply_mask=False)

    @pl.when(needs_mask)
    def _mask():
        _process(apply_mask=True)

    # Last kv tile this q tile ever sees under the triangular schedule.
    kv_last = jnp.minimum(n_kv - 1, ((qi + 1) * blk_q - 1) // blk_kv)

    @pl.when(ki == kv_last)
    def _finalize():
        # one EUP reciprocal + one store per q tile
        out = acc_sc[...] * pl.reciprocal(l_sc[...], approx=True)
        o_ref[...] = out.astype(o_ref.dtype).reshape(o_ref.shape)


# --------------------------------------------------------------------------- #
# Wrapper                                                                     #
# --------------------------------------------------------------------------- #
def attention_forward(x, w_qkv, *, n_head,
                      block_q=512, block_kv=128, block_t=512):
    """x: (B, T, E); w_qkv: pre-fused (E, 3E) weight from fuse_qkv_weights().

    Compute dtype for the MXU is w_qkv.dtype (bf16 recommended); accumulation is
    always f32 and the returned dtype matches x.dtype.
    """
    b, t, e = x.shape
    assert e % n_head == 0, "n_embd must be divisible by n_head"
    assert w_qkv.shape == (e, 3 * e)
    d = e // n_head
    compute_dtype = w_qkv.dtype
    out_dtype = x.dtype
    vmem_limit = _vmem_limit_bytes()

    # --- tile selection (pad T instead of degenerating to a single giant tile) ---
    t8 = _round_up(t, 8)
    blk_q = t8 if t8 <= block_q else block_q
    blk_kv = min(block_kv, blk_q)
    if blk_q % blk_kv != 0:
        blk_kv = blk_q                       # keep blk_kv | blk_q | t_pad
    t_pad = _round_up(t, blk_q)
    bt = min(block_t, t_pad)
    if t_pad % bt != 0:
        bt = blk_q                           # blk_q always divides t_pad

    x_c = x.astype(compute_dtype)
    if t_pad != t:
        x_c = jnp.pad(x_c, ((0, 0), (0, t_pad - t), (0, 0)))

    # --- kernel 1: fused QKV projection, head-major q/k/v ------------------
    qkv_kernel = functools.partial(_qkv_proj_kernel, n_head=n_head, head_dim=d)
    head_shape = jax.ShapeDtypeStruct((b, n_head, t_pad, d), compute_dtype)
    hm_spec = pl.BlockSpec((1, n_head, bt, d), lambda bi, ti: (bi, 0, ti, 0))

    q, k, v = pl.pallas_call(
        qkv_kernel,
        out_shape=(head_shape, head_shape, head_shape),
        grid_spec=pltpu.PrefetchScalarGridSpec(
            num_scalar_prefetch=0,
            grid=(b, t_pad // bt),
            in_specs=[
                pl.BlockSpec((1, bt, e), lambda bi, ti: (bi, ti, 0)),
                # TODO(synk): for very large E (bf16 E>=4096 weight ~96 MiB) tile the
                #             weight over 3E / E (or stream it from pl.ANY) instead of
                #             keeping the full block resident; also single-buffer it.
                pl.BlockSpec((e, 3 * e), lambda bi, ti: (0, 0)),
            ],
            out_specs=[hm_spec, hm_spec, hm_spec],
        ),
        compiler_params=pltpu.CompilerParams(
            dimension_semantics=("parallel", "parallel"),
            vmem_limit_bytes=vmem_limit,
        ),
    )(x_c, w_qkv)

    # --- triangular (qi, ki) schedule: no dead above-diagonal grid steps ----
    n_q = t_pad // blk_q
    n_kv = t_pad // blk_kv
    q_ids, k_ids = [], []
    for qi in range(n_q):
        kv_last = min(n_kv - 1, ((qi + 1) * blk_q - 1) // blk_kv)
        for ki in range(kv_last + 1):
            q_ids.append(qi)
            k_ids.append(ki)
    n_steps = len(q_ids)
    q_ids = jnp.asarray(q_ids, dtype=jnp.int32)
    k_ids = jnp.asarray(k_ids, dtype=jnp.int32)

    flash_kernel = functools.partial(
        _flash_attn_kernel, blk_q=blk_q, blk_kv=blk_kv, n_kv=n_kv)

    q_spec = pl.BlockSpec((1, 1, blk_q, d),
                          lambda bi, hi, si, qidx, kidx: (bi, hi, qidx[si], 0))
    kv_spec = pl.BlockSpec((1, 1, blk_kv, d),
                           lambda bi, hi, si, qidx, kidx: (bi, hi, kidx[si], 0))

    direct_merge = (d % 128 == 0)
    if direct_merge:
        # Write each head's output straight into its lane slot of (B, T, E):
        # drops the final transpose HBM pass (lane-dense, D is a multiple of 128).
        attn_out_shape = jax.ShapeDtypeStruct((b, t_pad, e), out_dtype)
        out_spec = pl.BlockSpec((1, blk_q, d),
                                lambda bi, hi, si, qidx, kidx: (bi, qidx[si], hi))
    else:
        # TODO(synk): for head_dim < 128, pack two heads per grid step to get a
        #             128-wide lane layout for p@V and unmasked output stores.
        attn_out_shape = jax.ShapeDtypeStruct((b, n_head, t_pad, d), out_dtype)
        out_spec = pl.BlockSpec((1, 1, blk_q, d),
                                lambda bi, hi, si, qidx, kidx: (bi, hi, qidx[si], 0))

    out = pl.pallas_call(
        flash_kernel,
        out_shape=attn_out_shape,
        grid_spec=pltpu.PrefetchScalarGridSpec(
            num_scalar_prefetch=2,
            grid=(b, n_head, n_steps),
            in_specs=[q_spec, kv_spec, kv_spec],
            out_specs=out_spec,
            scratch_shapes=[
                pltpu.VMEM((blk_q, 1), jnp.float32),   # running max  m
                pltpu.VMEM((blk_q, 1), jnp.float32),   # running sum  l
                pltpu.VMEM((blk_q, d), jnp.float32),   # output accumulator
            ],
        ),
        compiler_params=pltpu.CompilerParams(
            dimension_semantics=("parallel", "parallel", "arbitrary"),
            vmem_limit_bytes=vmem_limit,
        ),
    )(q_ids, k_ids, q, k, v)

    if direct_merge:
        res = out
    else:
        # (B, H, T, D) -> (B, T, H, D) -> (B, T, E)
        res = jnp.transpose(out, (0, 2, 1, 3)).reshape(b, t_pad, e)

    if t_pad != t:
        res = res[:, :t, :]
    return res


# --------------------------------------------------------------------------- #
# Pure-JAX reference mirroring the PyTorch fast path (eval mode)              #
# --------------------------------------------------------------------------- #
def _reference(x, wq, wk, wv, n_head):
    b, t, e = x.shape
    d = e // n_head
    scale = 1.0 / (d ** 0.5)
    q = (x @ wq.T).reshape(b, t, n_head, d).transpose(0, 2, 1, 3)
    k = (x @ wk.T).reshape(b, t, n_head, d).transpose(0, 2, 1, 3)
    v = (x @ wv.T).reshape(b, t, n_head, d).transpose(0, 2, 1, 3)
    s = jnp.einsum("bhtd,bhsd->bhts", q, k) * scale
    mask = jnp.tril(jnp.ones((t, t), bool))
    s = jnp.where(mask, s, -jnp.inf)
    p = jax.nn.softmax(s, axis=-1)
    a = jnp.einsum("bhts,bhsd->bhtd", p, v)
    return a.transpose(0, 2, 1, 3).reshape(b, t, e)


def _run_case(key, b, t, e, h, label):
    kx, kq, kk, kv_ = jax.random.split(key, 4)
    x = jax.random.normal(kx, (b, t, e), dtype=jnp.float32)
    init_scale = 1.0 / (e ** 0.5)
    wq = jax.random.uniform(kq, (e, e), jnp.float32, -init_scale, init_scale)
    wk = jax.random.uniform(kk, (e, e), jnp.float32, -init_scale, init_scale)
    wv = jax.random.uniform(kv_, (e, e), jnp.float32, -init_scale, init_scale)

    ref = _reference(x, wq, wk, wv, h)

    # f32-operand path (accuracy check). Tolerance accounts for TPU default matmul
    # precision and the flash-style reassociation of the softmax accumulation.
    w32 = fuse_qkv_weights(wq, wk, wv, n_head=h, compute_dtype=jnp.float32)
    out = jax.block_until_ready(attention_forward(x, w32, n_head=h))
    assert out.shape == (b, t, e)
    assert jnp.allclose(out, ref, atol=2e-2, rtol=2e-2), f"f32 mismatch ({label})"

    # bf16-MXU path (f32 accumulation) — the recommended high-throughput config.
    wbf = fuse_qkv_weights(wq, wk, wv, n_head=h, compute_dtype=jnp.bfloat16)
    out_bf = jax.block_until_ready(attention_forward(x, wbf, n_head=h))
    assert out_bf.shape == (b, t, e)
    assert jnp.allclose(out_bf, ref, atol=1e-1, rtol=1e-1), f"bf16 mismatch ({label})"


if __name__ == "__main__":
    key = jax.random.PRNGKey(0)
    k1, k2, k3 = jax.random.split(key, 3)

    # Small shapes consistent with the module: batch=2, seq=8, n_embd=32, n_head=4.
    _run_case(k1, b=2, t=8, e=32, h=4, label="small")

    # Multi kv-tile flash path (blk_q=256, blk_kv=128): online softmax across
    # kv tiles + causal masking on boundary-crossing tiles, head_dim=64.
    _run_case(k2, b=1, t=256, e=128, h=2, label="multi-kv-tile")

    # Non-multiple-of-tile T: exercises padding, multiple q tiles, and the
    # triangular schedule's kv-tile skipping (blk_q=512, blk_kv=128, T_pad=1024).
    _run_case(k3, b=1, t=600, e=128, h=2, label="padded-triangular")

    print("KERNEL_OK")
</pallas_src>

<mosaic_0001>
module attributes {stable_mosaic.version = 11 : i64} {
  func.func @_qkv_proj_kernel(%arg0: i32, %arg1: i32, %arg2: memref<1x8x32xf32, #tpu.memory_space<vmem>>, %arg3: memref<32x96xf32, #tpu.memory_space<vmem>>, %arg4: memref<1x4x8x8xf32, #tpu.memory_space<vmem>>, %arg5: memref<1x4x8x8xf32, #tpu.memory_space<vmem>>, %arg6: memref<1x4x8x8xf32, #tpu.memory_space<vmem>>) attributes {dimension_semantics = [#tpu.dimension_semantics<parallel>, #tpu.dimension_semantics<parallel>], iteration_bounds = array<i64: 2, 1>, scalar_prefetch = 0 : i64, scratch_operands = 0 : i64, tpu.core_type = #tpu.core_type<tc>, window_params = [{transform_indices = @transform_0, window_bounds = array<i64: 1, 8, 32>}, {pipeline_mode = #tpu.pipeline_mode<synchronous>, transform_indices = @transform_1, window_bounds = array<i64: 32, 96>}, {transform_indices = @transform_2, window_bounds = array<i64: 1, 4, 8, 8>}, {transform_indices = @transform_3, window_bounds = array<i64: 1, 4, 8, 8>}, {transform_indices = @transform_4, window_bounds = array<i64: 1, 4, 8, 8>}]} {
    %c0 = arith.constant 0 : index
    %c0_0 = arith.constant 0 : index
    %c0_1 = arith.constant 0 : index
    %0 = vector.load %arg2[%c0, %c0_0, %c0_1] : memref<1x8x32xf32, #tpu.memory_space<vmem>>, vector<1x8x32xf32>
    %1 = vector.shape_cast %0 : vector<1x8x32xf32> to vector<8x32xf32>
    %c0_2 = arith.constant 0 : index
    %c0_3 = arith.constant 0 : index
    %2 = vector.load %arg3[%c0_2, %c0_3] : memref<32x96xf32, #tpu.memory_space<vmem>>, vector<32x96xf32>
    %cst = arith.constant dense<0.000000e+00> : vector<8x96xf32>
    %3 = tpu.matmul %1, %2, %cst {dimension_numbers = #tpu.dot_dimension_numbers<[1], [0], [0], [1], [0, 0, 1, 1], [], []>} : vector<8x32xf32>, vector<32x96xf32>, vector<8x96xf32> -> vector<8x96xf32>
    %4 = vector.extract_strided_slice %3 {offsets = [0, 0], sizes = [8, 8], strides = [1, 1]} : vector<8x96xf32> to vector<8x8xf32>
    %c0_4 = arith.constant 0 : index
    %c0_5 = arith.constant 0 : index
    %c0_6 = arith.constant 0 : index
    %c0_7 = arith.constant 0 : index
    %5 = vector.load %arg4[%c0_4, %c0_5, %c0_6, %c0_7] : memref<1x4x8x8xf32, #tpu.memory_space<vmem>>, vector<1x1x8x8xf32>
    %6 = vector.shape_cast %5 : vector<1x1x8x8xf32> to vector<8x8xf32>
    %7 = vector.shape_cast %4 : vector<8x8xf32> to vector<1x1x8x8xf32>
    tpu.vector_store %arg4[%c0_4, %c0_5, %c0_6, %c0_7], %7 {strides = array<i32>} : memref<1x4x8x8xf32, #tpu.memory_space<vmem>>, vector<1x1x8x8xf32>,
    %8 = vector.extract_strided_slice %3 {offsets = [0, 8], sizes = [8, 8], strides = [1, 1]} : vector<8x96xf32> to vector<8x8xf32>
    %c0_8 = arith.constant 0 : index
    %c1 = arith.constant 1 : index
    %c0_9 = arith.constant 0 : index
    %c0_10 = arith.constant 0 : index
    %9 = vector.load %arg4[%c0_8, %c1, %c0_9, %c0_10] : memref<1x4x8x8xf32, #tpu.memory_space<vmem>>, vector<1x1x8x8xf32>
    %10 = vector.shape_cast %9 : vector<1x1x8x8xf32> to vector<8x8xf32>
    %11 = vector.shape_cast %8 : vector<8x8xf32> to vector<1x1x8x8xf32>
    tpu.vector_store %arg4[%c0_8, %c1, %c0_9, %c0_10], %11 {strides = array<i32>} : memref<1x4x8x8xf32, #tpu.memory_space<vmem>>, vector<1x1x8x8xf32>,
    %12 = vector.extract_strided_slice %3 {offsets = [0, 16], sizes = [8, 8], strides = [1, 1]} : vector<8x96xf32> to vector<8x8xf32>
    %c0_11 = arith.constant 0 : index
    %c2 = arith.constant 2 : index
    %c0_12 = arith.constant 0 : index
    %c0_13 = arith.constant 0 : index
    %13 = vector.load %arg4[%c0_11, %c2, %c0_12, %c0_13] : memref<1x4x8x8xf32, #tpu.memory_space<vmem>>, vector<1x1x8x8xf32>
    %14 = vector.shape_cast %13 : vector<1x1x8x8xf32> to vector<8x8xf32>
    %15 = vector.shape_cast %12 : vector<8x8xf32> to vector<1x1x8x8xf32>
    tpu.vector_store %arg4[%c0_11, %c2, %c0_12, %c0_13], %15 {strides = array<i32>} : memref<1x4x8x8xf32, #tpu.memory_space<vmem>>, vector<1x1x8x8xf32>,
    %16 = vector.extract_strided_slice %3 {offsets = [0, 24], sizes = [8, 8], strides = [1, 1]} : vector<8x96xf32> to vector<8x8xf32>
    %c0_14 = arith.constant 0 : index
    %c3 = arith.constant 3 : index
    %c0_15 = arith.constant 0 : index
    %c0_16 = arith.constant 0 : index
    %17 = vector.load %arg4[%c0_14, %c3, %c0_15, %c0_16] : memref<1x4x8x8xf32, #tpu.memory_space<vmem>>, vector<1x1x8x8xf32>
    %18 = vector.shape_cast %17 : vector<1x1x8x8xf32> to vector<8x8xf32>
    %19 = vector.shape_cast %16 : vector<8x8xf32> to vector<1x1x8x8xf32>
    tpu.vector_store %arg4[%c0_14, %c3, %c0_15, %c0_16], %19 {strides = array<i32>} : memref<1x4x8x8xf32, #tpu.memory_space<vmem>>, vector<1x1x8x8xf32>,
    %20 = vector.extract_strided_slice %3 {offsets = [0, 32], sizes = [8, 8], strides = [1, 1]} : vector<8x96xf32> to vector<8x8xf32>
    %c0_17 = arith.constant 0 : index
    %c0_18 = arith.constant 0 : index
    %c0_19 = arith.constant 0 : index
    %c0_20 = arith.constant 0 : index
    %21 = vector.load %arg5[%c0_17, %c0_18, %c0_19, %c0_20] : memref<1x4x8x8xf32, #tpu.memory_space<vmem>>, vector<1x1x8x8xf32>
    %22 = vector.shape_cast %21 : vector<1x1x8x8xf32> to vector<8x8xf32>
    %23 = vector.shape_cast %20 : vector<8x8xf32> to vector<1x1x8x8xf32>
    tpu.vector_store %arg5[%c0_17, %c0_18, %c0_19, %c0_20], %23 {strides = array<i32>} : memref<1x4x8x8xf32, #tpu.memory_space<vmem>>, vector<1x1x8x8xf32>,
    %24 = vector.extract_strided_slice %3 {offsets = [0, 40], sizes = [8, 8], strides = [1, 1]} : vector<8x96xf32> to vector<8x8xf32>
    %c0_21 = arith.constant 0 : index
    %c1_22 = arith.constant 1 : index
    %c0_23 = arith.constant 0 : index
    %c0_24 = arith.constant 0 : index
    %25 = vector.load %arg5[%c0_21, %c1_22, %c0_23, %c0_24] : memref<1x4x8x8xf32, #tpu.memory_space<vmem>>, vector<1x1x8x8xf32>
    %26 = vector.shape_cast %25 : vector<1x1x8x8xf32> to vector<8x8xf32>
    %27 = vector.shape_cast %24 : vector<8x8xf32> to vector<1x1x8x8xf32>
    tpu.vector_store %arg5[%c0_21, %c1_22, %c0_23, %c0_24], %27 {strides = array<i32>} : memref<1x4x8x8xf32, #tpu.memory_space<vmem>>, vector<1x1x8x8xf32>,
    %28 = vector.extract_strided_slice %3 {offsets = [0, 48], sizes = [8, 8], strides = [1, 1]} : vector<8x96xf32> to vector<8x8xf32>
    %c0_25 = arith.constant 0 : index
    %c2_26 = arith.constant 2 : index
    %c0_27 = arith.constant 0 : index
    %c0_28 = arith.constant 0 : index
    %29 = vector.load %arg5[%c0_25, %c2_26, %c0_27, %c0_28] : memref<1x4x8x8xf32, #tpu.memory_space<vmem>>, vector<1x1x8x8xf32>
    %30 = vector.shape_cast %29 : vector<1x1x8x8xf32> to vector<8x8xf32>
    %31 = vector.shape_cast %28 : vector<8x8xf32> to vector<1x1x8x8xf32>
    tpu.vector_store %arg5[%c0_25, %c2_26, %c0_27, %c0_28], %31 {strides = array<i32>} : memref<1x4x8x8xf32, #tpu.memory_space<vmem>>, vector<1x1x8x8xf32>,
    %32 = vector.extract_strided_slice %3 {offsets = [0, 56], sizes = [8, 8], strides = [1, 1]} : vector<8x96xf32> to vector<8x8xf32>
    %c0_29 = arith.constant 0 : index
    %c3_30 = arith.constant 3 : index
    %c0_31 = arith.constant 0 : index
    %c0_32 = arith.constant 0 : index
    %33 = vector.load %arg5[%c0_29, %c3_30, %c0_31, %c0_32] : memref<1x4x8x8xf32, #tpu.memory_space<vmem>>, vector<1x1x8x8xf32>
    %34 = vector.shape_cast %33 : vector<1x1x8x8xf32> to vector<8x8xf32>
    %35 = vector.shape_cast %32 : vector<8x8xf32> to vector<1x1x8x8xf32>
    tpu.vector_store %arg5[%c0_29, %c3_30, %c0_31, %c0_32], %35 {strides = array<i32>} : memref<1x4x8x8xf32, #tpu.memory_space<vmem>>, vector<1x1x8x8xf32>,
    %36 = vector.extract_strided_slice %3 {offsets = [0, 64], sizes = [8, 8], strides = [1, 1]} : vector<8x96xf32> to vector<8x8xf32>
    %c0_33 = arith.constant 0 : index
    %c0_34 = arith.constant 0 : index
    %c0_35 = arith.constant 0 : index
    %c0_36 = arith.constant 0 : index
    %37 = vector.load %arg6[%c0_33, %c0_34, %c0_35, %c0_36] : memref<1x4x8x8xf32, #tpu.memory_space<vmem>>, vector<1x1x8x8xf32>
    %38 = vector.shape_cast %37 : vector<1x1x8x8xf32> to vector<8x8xf32>
    %39 = vector.shape_cast %36 : vector<8x8xf32> to vector<1x1x8x8xf32>
    tpu.vector_store %arg6[%c0_33, %c0_34, %c0_35, %c0_36], %39 {strides = array<i32>} : memref<1x4x8x8xf32, #tpu.memory_space<vmem>>, vector<1x1x8x8xf32>,
    %40 = vector.extract_strided_slice %3 {offsets = [0, 72], sizes = [8, 8], strides = [1, 1]} : vector<8x96xf32> to vector<8x8xf32>
    %c0_37 = arith.constant 0 : index
    %c1_38 = arith.constant 1 : index
    %c0_39 = arith.constant 0 : index
    %c0_40 = arith.constant 0 : index
    %41 = vector.load %arg6[%c0_37, %c1_38, %c0_39, %c0_40] : memref<1x4x8x8xf32, #tpu.memory_space<vmem>>, vector<1x1x8x8xf32>
    %42 = vector.shape_cast %41 : vector<1x1x8x8xf32> to vector<8x8xf32>
    %43 = vector.shape_cast %40 : vector<8x8xf32> to vector<1x1x8x8xf32>
    tpu.vector_store %arg6[%c0_37, %c1_38, %c0_39, %c0_40], %43 {strides = array<i32>} : memref<1x4x8x8xf32, #tpu.memory_space<vmem>>, vector<1x1x8x8xf32>,
    %44 = vector.extract_strided_slice %3 {offsets = [0, 80], sizes = [8, 8], strides = [1, 1]} : vector<8x96xf32> to vector<8x8xf32>
    %c0_41 = arith.constant 0 : index
    %c2_42 = arith.constant 2 : index
    %c0_43 = arith.constant 0 : index
    %c0_44 = arith.constant 0 : index
    %45 = vector.load %arg6[%c0_41, %c2_42, %c0_43, %c0_44] : memref<1x4x8x8xf32, #tpu.memory_space<vmem>>, vector<1x1x8x8xf32>
    %46 = vector.shape_cast %45 : vector<1x1x8x8xf32> to vector<8x8xf32>
    %47 = vector.shape_cast %44 : vector<8x8xf32> to vector<1x1x8x8xf32>
    tpu.vector_store %arg6[%c0_41, %c2_42, %c0_43, %c0_44], %47 {strides = array<i32>} : memref<1x4x8x8xf32, #tpu.memory_space<vmem>>, vector<1x1x8x8xf32>,
    %48 = vector.extract_strided_slice %3 {offsets = [0, 88], sizes = [8, 8], strides = [1, 1]} : vector<8x96xf32> to vector<8x8xf32>
    %c0_45 = arith.constant 0 : index
    %c3_46 = arith.constant 3 : index
    %c0_47 = arith.constant 0 : index
    %c0_48 = arith.constant 0 : index
    %49 = vector.load %arg6[%c0_45, %c3_46, %c0_47, %c0_48] : memref<1x4x8x8xf32, #tpu.memory_space<vmem>>, vector<1x1x8x8xf32>
    %50 = vector.shape_cast %49 : vector<1x1x8x8xf32> to vector<8x8xf32>
    %51 = vector.shape_cast %48 : vector<8x8xf32> to vector<1x1x8x8xf32>
    tpu.vector_store %arg6[%c0_45, %c3_46, %c0_47, %c0_48], %51 {strides = array<i32>} : memref<1x4x8x8xf32, #tpu.memory_space<vmem>>, vector<1x1x8x8xf32>,
    return
  }
  func.func @transform_0(%arg0: i32, %arg1: i32) -> (i32, i32, i32) {
    %c0_i32 = arith.constant 0 : i32
    %c0_i32_0 = arith.constant 0 : i32
    return %arg0, %arg1, %c0_i32 : i32, i32, i32
  }
  func.func @transform_1(%arg0: i32, %arg1: i32) -> (i32, i32) {
    %c0_i32 = arith.constant 0 : i32
    %c0_i32_0 = arith.constant 0 : i32
    %c0_i32_1 = arith.constant 0 : i32
    return %c0_i32, %c0_i32_0 : i32, i32
  }
  func.func @transform_2(%arg0: i32, %arg1: i32) -> (i32, i32, i32, i32) {
    %c0_i32 = arith.constant 0 : i32
    %c0_i32_0 = arith.constant 0 : i32
    %c0_i32_1 = arith.constant 0 : i32
    return %arg0, %c0_i32, %arg1, %c0_i32_0 : i32, i32, i32, i32
  }
  func.func @transform_3(%arg0: i32, %arg1: i32) -> (i32, i32, i32, i32) {
    %c0_i32 = arith.constant 0 : i32
    %c0_i32_0 = arith.constant 0 : i32
    %c0_i32_1 = arith.constant 0 : i32
    return %arg0, %c0_i32, %arg1, %c0_i32_0 : i32, i32, i32, i32
  }
  func.func @transform_4(%arg0: i32, %arg1: i32) -> (i32, i32, i32, i32) {
    %c0_i32 = arith.constant 0 : i32
    %c0_i32_0 = arith.constant 0 : i32
    %c0_i32_1 = arith.constant 0 : i32
    return %arg0, %c0_i32, %arg1, %c0_i32_0 : i32, i32, i32, i32
  }
}

</mosaic_0001>

<bundles_post_ra>
// kernel: tpu_custom_call.1
= control target key start
LH: loop header
LB: loop body
LE: loop exit
PB: predicated region body
PF: predicated region fallthrough
CT: control target
= control target key end

     0   :  { %10 = vsyncpa [#allocation3], 0  ;;  %s1357_s0 = inlined_call_operand.hbm [shape: f32[2,8,32], index: 0, kind: input, shape index: {}]   ;;  %s1358_s1 = inlined_call_operand.hbm [shape: f32[32,96], index: 1, kind: input, shape index: {}]   ;;  %s1359_s2 = inlined_call_operand.hbm [shape: f32[2,4,8,8], index: 2, kind: output, shape index: {0}]   ;;  %s1360_s3 = inlined_call_operand.hbm [shape: f32[2,4,8,8], index: 3, kind: output, shape index: {1}]   ;;  %s1361_s4 = inlined_call_operand.hbm [shape: f32[2,4,8,8], index: 4, kind: output, shape index: {2}]  }
   0x1   :  { %12 = vsyncpa [#allocation3 + $0x1], 0 }
   0x2   :  { %13 = vsyncpa [#allocation6], 0 }
   0x3   :  { %14 = vsyncpa [#allocation4], 0 }
   0x4   :  { %16 = vsyncpa [#allocation4 + $0x1], 0 }
   0x5   :  { %17 = vsyncpa [#allocation9], 0 }
   0x6   :  { %19 = vsyncpa [#allocation9 + $0x1], 0  ;;  %s1034_s15 = smov 0   ;;  %s1036_s16 = smov 0  }
   0x7   :  { %s1038_s17 = smov 0   ;;  %s1040_s18 = smov 0  }
   0x8   :  { %s1042_s19 = smov 0   ;;  %s1044_s20 = smov 0  }
   0x9 LB: > { %s1065_s21 = sadd.s32 4294967295, %s984_s20   ;;  %s1365_s22 = sadd.s32 4294967294, %s984_s20   ;;  %s984_s20 = sphi %s1044_s20, %s25_s20   ;;  %s980_s19 = sphi %s1042_s19, %s1385_s19   ;;  %s976_s18 = sphi %s1040_s18, %s1384_s18   ;;  %s972_s17 = sphi %s1038_s17, %s1383_s17   ;;  %s968_s16 = sphi %s1036_s16, %s1382_s16   ;;  %s964_s15 = sphi %s1034_s15, %s1381_s15  }
   0xa   : > { %p59_p0 = scmp.ne.s32.totalorder %s968_s16, %s964_s15  ;;  %p1362_p1 = scmp.eq.s32.totalorder %s1065_s21, 0 }
   0xb   : > { %p112_p3 = scmp.eq.s32.totalorder %s1365_s22, 1  ;;  %p622_p5 = scmp.ge.s32.totalorder %s984_s20, 1 }
   0xc   : > { %p1076_p4 = por %p1362_p1, %p59_p0  ;;  %p175_p7 = scmp.lt.s32.totalorder %s984_s20, 3 }
   0xd   : > { %p1081_p6 = por %p112_p3, %p59_p0  ;;  %s986_s26 = smov [#allocation5]  }
   0xe   : > { %s1366_s23 = scalar_select %p1076_p4, 1, 0 }
   0xf   : > { %s1367_s24 = scalar_select %p1081_p6, 1, 0 }
  0x10   : > { %p1086_p8 = pnand %p622_p5, %p175_p7  ;;  %s187_s27 = sshll.u32 %s986_s26, 4  ;;  %s188_s27 = int_to_ptr.vmem [resolvable:$true] %s187_s27 }
  0x11   : > { %s37_s29 = sadd.s32 1, %s980_s19  ;;  %s780_s6 = scalar_lea.hbm %s1358_s1, 512 }
  0x12   : > { %s1368_s25 = scalar_select %p1086_p8, 1, 0 }
  0x13   : > { %p691_p9 = pneg %p1086_p8  ;;  %p781_p12 = scmp.ne.s32.totalorder %s1358_s1, %s780_s6 }
  0x14   : > { %p787_p5 = scmp.lt.u32.totalorder %s780_s6, %s1358_s1 }
  0x15   : > { %p1095_p11 = pnand %p691_p9, %p1362_p1 }
  0x17   : > { %p782_p13 = pneg %p1095_p11 }
  0x19   : > { %p783_p0 = pnand %p782_p13, %p781_p12 }
  0x1b   : > { %p784_p3 = pneg %p783_p0 }
  0x1d   : > { %p789_p7 = pnand %p787_p5, %p784_p3 }
  0x1f   : > { %792 = shalt.err (!%p789_p7)
}
  0x20   : > { %s793_s11 = scalar_lea.vmem %s188_s27, 512  ;;  %p801_p2 = scmp.lt.s32.totalorder %s188_s27, %s188_s27 }
  0x21   : > { %p794_p9 = scmp.ne.s32.totalorder %s188_s27, %s793_s11  ;;  %p802_p6 = scmp.lt.s32.totalorder %s793_s11, %s793_s11 }
  0x23   : > { %p796_p10 = pnand %p794_p9, %p782_p13  ;;  %p803_p4 = por %p802_p6, %p801_p2 }
  0x25   : > { %p797_p1 = pneg %p796_p10 }
  0x27   : > { %p804_p8 = pnand %p803_p4, %p797_p1 }
  0x29   : > { %807 = shalt.err (!%p804_p8)
}
  0x2a   : > { %s987_s12 = smov 128   ;;  %s988_s13 = smov 8  }
  0x2b   : > { %694 = dma.hbm_to_vmem [thread:$0]  (!%p1095_p11), %s1358_s1, 512, %s188_s27, [#allocation6], %s987_s12, %s987_s12, %s988_s13  }
  0x2c   : > { %p39_p1 = scmp.ge.s32.totalorder %s37_s29, 2  ;;  %s46_s30 = sadd.s32 1, %s972_s17 }
  0x2d   : > { %p53_p2 = scmp.ne.s32.totalorder %s972_s17, %s968_s16  ;;  %p54_p4 = scmp.eq.s32.totalorder %s984_s20, 0 }
  0x2e   : > { %s1387_s29 = smov (%p39_p1, %s37_s29), 0  ;;  %p1371_p8 = scmp.eq.s32.totalorder %s1065_s21, 1 }
  0x2f   : > { %p1122_p6 = por %p54_p4, %p53_p2  ;;  %s41_s28 = ssub.s32 %s980_s19, %s1387_s29 }
  0x30   : > { %p1128_p10 = por %p1371_p8, %p53_p2  ;;  %p710_p12 = scmp.lt.s32.totalorder %s984_s20, 2 }
  0x31   : > { %p44_p11 = scmp.eq.s32.totalorder %s41_s28, 0  ;;  %s201_s27 = sand.u32 1, %s972_s17  }
  0x32   : > { %s625_s7 = sshll.u32 %s201_s27, 3  ;;  %s626_s9 = sshll.u32 %s980_s19, 7 }
  0x33   : > { %s1137_s8 = scalar_select %p44_p11, %s972_s17, %s46_s30  }
  0x34   : > { %s1143_s12 = scalar_lea.hbm %s1357_s0, %s626_s9  ;;  %s205_s13 = scalar_lea.vmem [#allocation2], %s625_s7 }
  0x35   : > { %s213_s14 = sshll.u32 %s205_s13, 4  ;;  %p1149_p13 = pnand %p710_p12, %p1122_p6  ;;  %s1145_s14 = int_to_ptr.vmem [resolvable:$true] %s213_s14 }
  0x36   : > { %s202_s30 = scalar_lea.sflag [#allocation3], %s201_s27  ;;  %s808_s28 = scalar_lea.hbm %s1143_s12, 128 }
  0x37   : > { %p809_p0 = scmp.ne.s32.totalorder %s1143_s12, %s808_s28  ;;  %p810_p3 = pneg %p1149_p13 }
  0x38   : > { %s813_s10 = scalar_lea.hbm %s1357_s0, 256  ;;  %p814_p9 = scmp.lt.u32.totalorder %s1143_s12, %s1357_s0 }
  0x39   : > { %p811_p5 = pnand %p810_p3, %p809_p0  ;;  %p815_p1 = scmp.lt.u32.totalorder %s813_s10, %s808_s28 }
  0x3a   : > { %p817_p4 = scmp.lt.u32.totalorder %s808_s28, %s1143_s12 }
  0x3b   : > { %p812_p7 = pneg %p811_p5  ;;  %p816_p2 = por %p815_p1, %p814_p9 }
  0x3d   : > { %p818_p6 = por %p817_p4, %p816_p2 }
  0x3f   : > { %p819_p8 = pnand %p818_p6, %p812_p7 }
  0x41   : > { %822 = shalt.err (!%p819_p8)
}
  0x42   : > { %s823_s27 = scalar_lea.vmem %s1145_s14, 128  ;;  %s989_s13 = smov [#allocation2]  }
  0x43   : > { %p824_p12 = scmp.ne.s32.totalorder %s1145_s14, %s823_s27  ;;  %s828_s7 = sshll.u32 %s989_s13, 4  ;;  %s829_s7 = int_to_ptr.vmem [resolvable:$false] %s828_s7 }
  0x44   : > { %s830_s9 = scalar_lea.vmem %s829_s7, 256  ;;  %p831_p5 = scmp.lt.s32.totalorder %s1145_s14, %s829_s7 }
  0x45   : > { %p826_p11 = pnand %p824_p12, %p810_p3  ;;  %p832_p9 = scmp.lt.s32.totalorder %s830_s9, %s823_s27 }
  0x47   : > { %p827_p0 = pneg %p826_p11  ;;  %p833_p1 = por %p832_p9, %p831_p5 }
  0x49   : > { %p834_p2 = pnand %p833_p1, %p827_p0 }
  0x4b   : > { %837 = shalt.err (!%p834_p2)
}
  0x4c   : > { %698 = dma.hbm_to_vmem [thread:$0]  (!%p1149_p13), %s1143_s12, 128, %s1145_s14, %s202_s30  }
  0x4d   : > { %p1374_p7 = scmp.ne.s32.totalorder %s1368_s25, 0 }
  0x4e   : > { %s1181_s28 = sand.u32 (!%p1374_p7), 1, %s968_s16   ;;  %p1375_p3 = scmp.ne.s32.totalorder (!%p1374_p7), %s1366_s23, 0 }
  0x4f   : > { %222 = sbr.rel (%p1374_p7) target bundleno = 493 (0x1ed), region = 28  ;;  %s628_s10 = sshll.u32 (!%p1374_p7), %s1181_s28, 3 }
  0x50   : > { %s225_s5 = scalar_lea.sflag (!%p1374_p7), [#allocation3], %s1181_s28  ;;  %s228_s11 = scalar_lea.vmem (!%p1374_p7), [#allocation2], %s628_s10 }
  0x56   : > { %947 = dma.done.wait (%p1375_p3), %s225_s5, 128  }
  0x57   : > { %949 = vsyncadd (%p1375_p3), %s225_s5, 4294967168  ;;  %p1376_p4 = scmp.eq.s32.totalorder %s1065_s21, 0 }
  0x59   : > { %951 = dma.done.wait (%p1376_p4), [#allocation6], 512   ;;  %p1377_p13 = pmov %p1376_p4 }
  0x5a   : > { %v990_v0 = vmov 0.0|0.0   ;;  %vm991_vm0 = vmmov 0   ;;  %v992_v1 = vmov 0.0   ;;  %v268_v2 = vld [vmem:[#allocation5] sm:$0xff]  ;;  %v269_v3 = vld [vmem:[#allocation5 + $0x8] sm:$0xff]  ;;  %v270_v4 = vld [vmem:[#allocation5 + $0x10] sm:$0xff] }
  0x5b   : > { %953 = vsyncadd (%p1377_p13), [#allocation6], 4294966784  ;;  %673 = vmatprep.subr.bf16.mxu0 %v990_v0  ;;  %670 = vmatprep.mubr.msk.f32.mxu0 %vm991_vm0, %v992_v1  ;;  %v674_v5 = vpack.c.bf16 %v269_v3, %v268_v2  ;;  %v271_v6 = vld [vmem:[#allocation5 + $0x18] sm:$0xff]  ;;  %vm272_vm1 = vcmask 261120   ;;  %s1194_s23 = sshll.u32 %s1181_s28, 5  ;;  %vm346_vm2 = vcmask 64512  }
  0x5c   : > { %v677_v7 = vpack.c.bf16 %v271_v6, %v270_v4  ;;  %v267_v8 = vld [vmem:[%s228_s11] sm:$0xff]  ;;  %s993_s25 = smov 80   ;;  %s994_s12 = smov 96  }
  0x5d   : > { %675 = vmatpush3.bf16.msra.mxu0 %v674_v5  ;;  %s1197_s14 = scalar_lea.vmem [#allocation7], %s1194_s23  ;;  %s995_s26 = smov 72  }
  0x5e   : > { %676 = vmatprep.subr.bf16.mxu0 %v990_v0  ;;  %s996_s30 = smov 88   ;;  %s997_s27 = smov 112  }
  0x5f   : > { %s998_s13 = smov 120   ;;  %s999_s7 = smov 64  }
  0x60   : > { %s1000_s9 = smov 104   ;;  %s1001_s10 = smov 48  }
  0x61   : > { %678 = vmatpush3.bf16.msra.mxu0 %v677_v7  ;;  %s1002_s5 = smov 56   ;;  %s1003_s11 = smov 40  }
  0x64   : > { %671 = vmatmul.mubr.msk.f32.vlgmr.msra.gmra.mrb[0].mxu0 %vm272_vm1, %v267_v8 }
 0x137   : > { %v342_v9 = vpop.f32.mrb[0].mxu0 }
 0x138   : > { %373 = vrot.lane.b32.xlu1 %v342_v9, %s993_s25  ;;  %364 = vrot.lane.b32.xlu0 %v342_v9, %s994_s12  ;;  %v672_v10 = vpop.f32.mrb[1].mxu0  ;;  %347 = vst.msk [vmem:[%s1197_s14] sm:$0xff] %vm346_vm2, %v342_v9  ;;  %s259_s25 = scalar_lea.vmem [#allocation8], %s1194_s23 }
 0x139   : > { %s444_s12 = sshll.u32 %s259_s25, 4  ;;  %s1206_s12 = int_to_ptr.vmem [resolvable:$true] %s444_s12 }
 0x13c   : > { %378 = vrot.lane.b32.xlu1 %v342_v9, %s995_s26  ;;  %368 = vrot.lane.b32.xlu0 %v342_v9, %s996_s30  ;;  %s407_s26 = sand.u32 1, %s1065_s21   ;;  %s1204_s30 = sshll.u32 %s976_s18, 9 }
 0x13d   : > { %s1218_s18 = scalar_lea.sflag [#allocation9], %s407_s26  ;;  %s838_s21 = scalar_lea.vmem %s1206_s12, 512 }
 0x13e   : > { %p839_p6 = scmp.ne.s32.totalorder %s1206_s12, %s838_s21 }
 0x140   : > { %354 = vrot.lane.b32.xlu1 %v342_v9, %s997_s27  ;;  %349 = vrot.lane.b32.xlu0 %v342_v9, %s998_s13  ;;  %p840_p8 = pnand %p839_p6, %p1128_p10 }
 0x142   : > { %p841_p12 = pneg %p840_p8 }
 0x144   : > { %383 = vrot.lane.b32.xlu1 %v342_v9, %s999_s7  ;;  %359 = vrot.lane.b32.xlu0 %v342_v9, %s1000_s9  ;;  %s1214_s7 = scalar_lea.hbm %s1360_s3, %s1204_s30  ;;  %s1004_s9 = smov [#allocation8]  }
 0x148   : > { %392 = vrot.lane.b32.xlu1 %v342_v9, %s1001_s10  ;;  %387 = vrot.lane.b32.xlu0 %v342_v9, %s1002_s5  ;;  %s842_s10 = sshll.u32 %s1004_s9, 4  ;;  %s843_s10 = int_to_ptr.vmem [resolvable:$false] %s842_s10 }
 0x149   : > { %s844_s5 = scalar_lea.vmem %s843_s10, 1024  ;;  %p845_p11 = scmp.lt.s32.totalorder %s1206_s12, %s843_s10 }
 0x14a   : > { %p846_p0 = scmp.lt.s32.totalorder %s844_s5, %s838_s21 }
 0x14c   : > { %397 = vrot.lane.b32.xlu0 %v342_v9, %s1003_s11  ;;  %p847_p5 = por %p846_p0, %p845_p11 }
 0x14e   : > { %p848_p9 = pnand %p847_p5, %p841_p12 }
 0x1aa   : > { %v374_v11 = vpop.permute.xlu1 %373  ;;  %v365_v12 = vpop.permute.xlu0 %364 }
 0x1ab   : > { %638 = vst.msk [vmem:[%s259_s25 + $0x10] sm:$0xff] %vm346_vm2, %v374_v11  ;;  %367 = vst.msk [vmem:[%s259_s25] sm:$0xff] %vm346_vm2, %v365_v12 }
 0x1ae   : > { %v379_v13 = vpop.permute.xlu1 %378  ;;  %v369_v14 = vpop.permute.xlu0 %368 }
 0x1af   : > { %639 = vst.msk [vmem:[%s259_s25 + $0x18] sm:$0xff] %vm346_vm2, %v379_v13  ;;  %637 = vst.msk [vmem:[%s259_s25 + $0x8] sm:$0xff] %vm346_vm2, %v369_v14 }
 0x1b0   : > { %851 = shalt.err (!%p848_p9)
}
 0x1b1   : > { %s852_s11 = scalar_lea.hbm %s1214_s7, 512  ;;  %s856_s27 = scalar_lea.hbm %s1360_s3, 1024 }
 0x1b2   : > { %p853_p1 = scmp.ne.s32.totalorder %s1214_s7, %s852_s11  ;;  %p857_p3 = scmp.lt.u32.totalorder %s1214_s7, %s1360_s3 }
 0x1b3   : > { %p858_p4 = scmp.lt.u32.totalorder %s856_s27, %s852_s11  ;;  %p860_p6 = scmp.lt.u32.totalorder %s852_s11, %s1214_s7 }
 0x1b4   : > { %p854_p2 = pnand %p853_p1, %p1128_p10 }
 0x1b5   : > { %p859_p13 = por %p858_p4, %p857_p3 }
 0x1b6   : > { %p855_p7 = pneg %p854_p2 }
 0x1b7   : > { %p861_p8 = por %p860_p6, %p859_p13 }
 0x1b9   : > { %p862_p12 = pnand %p861_p8, %p855_p7 }
 0x1bb   : > { %865 = shalt.err (!%p862_p12)
}
 0x1bc   : > { %s1005_s21 = smov 128   ;;  %s1006_s10 = smov 8   ;;  %v355_v15 = vpop.permute.xlu1 %354  ;;  %v350_v16 = vpop.permute.xlu0 %349 }
 0x1bd   : > { %686 = dma.vmem_to_hbm [thread:$0]  (%p1128_p10), %s1206_s12, 512, %s1214_s7, %s1218_s18, %s1005_s21, %s1005_s21, %s1006_s10  }
 0x1be   : > { %s427_s5 = sshll.u32 %s1197_s14, 4  ;;  %635 = vst.msk [vmem:[%s1197_s14 + $0x10] sm:$0xff] %vm346_vm2, %v355_v15  ;;  %634 = vst.msk [vmem:[%s1197_s14 + $0x8] sm:$0xff] %vm346_vm2, %v350_v16  ;;  %s1256_s26 = scalar_lea.hbm %s1359_s2, %s1204_s30  ;;  %s1250_s5 = int_to_ptr.vmem [resolvable:$true] %s427_s5 }
 0x1bf   : > { %s1259_s12 = scalar_lea.vmem [#allocation10], %s1194_s23  ;;  %s403_s7 = scalar_lea.sflag [#allocation4], %s1181_s28 }
 0x1c0   : > { %v384_v17 = vpop.permute.xlu1 %383  ;;  %v360_v18 = vpop.permute.xlu0 %359  ;;  %s866_s27 = scalar_lea.vmem %s1250_s5, 512  ;;  %s1007_s13 = smov [#allocation7]  }
 0x1c1   : > { %386 = vst.msk [vmem:[%s1259_s12] sm:$0xff] %vm346_vm2, %v384_v17  ;;  %636 = vst.msk [vmem:[%s1197_s14 + $0x18] sm:$0xff] %vm346_vm2, %v360_v18  ;;  %p867_p11 = scmp.ne.s32.totalorder %s1250_s5, %s866_s27  ;;  %s870_s9 = sshll.u32 %s1007_s13, 4  ;;  %s871_s9 = int_to_ptr.vmem [resolvable:$false] %s870_s9 }
 0x1c2   : > { %s872_s11 = scalar_lea.vmem %s871_s9, 1024  ;;  %p873_p9 = scmp.lt.s32.totalorder %s1250_s5, %s871_s9 }
 0x1c3   : > { %p868_p0 = pnand %p867_p11, %p1128_p10  ;;  %p874_p1 = scmp.lt.s32.totalorder %s872_s11, %s866_s27 }
 0x1c5   : > { %p869_p5 = pneg %p868_p0  ;;  %p875_p2 = por %p874_p1, %p873_p9 }
 0x1c7   : > { %p876_p7 = pnand %p875_p2, %p869_p5 }
 0x1c9   : > { %879 = shalt.err (!%p876_p7)
}
 0x1ca   : > { %s880_s23 = scalar_lea.hbm %s1256_s26, 512  ;;  %s884_s13 = scalar_lea.hbm %s1359_s2, 1024 }
 0x1cb   : > { %p881_p3 = scmp.ne.s32.totalorder %s1256_s26, %s880_s23  ;;  %p885_p6 = scmp.lt.u32.totalorder %s1256_s26, %s1359_s2 }
 0x1cc   : > { %p886_p8 = scmp.lt.u32.totalorder %s884_s13, %s880_s23  ;;  %p888_p11 = scmp.lt.u32.totalorder %s880_s23, %s1256_s26 }
 0x1cd   : > { %p882_p4 = pnand %p881_p3, %p1128_p10 }
 0x1ce   : > { %p887_p12 = por %p886_p8, %p885_p6 }
 0x1cf   : > { %p883_p13 = pneg %p882_p4 }
 0x1d0   : > { %p889_p0 = por %p888_p11, %p887_p12 }
 0x1d2   : > { %p890_p5 = pnand %p889_p0, %p883_p13 }
 0x1d4   : > { %893 = shalt.err (!%p890_p5)
}
 0x1d5   : > { %685 = dma.vmem_to_hbm [thread:$0]  (%p1128_p10), %s1250_s5, 512, %s1256_s26, %s403_s7, %s1005_s21, %s1005_s21, %s1006_s10   ;;  %v393_v19 = vpop.permute.xlu1 %392  ;;  %v388_v20 = vpop.permute.xlu0 %387 }
 0x1d6   : > { %s461_s22 = sshll.u32 %s1259_s12, 4  ;;  %641 = vst.msk [vmem:[%s1259_s12 + $0x10] sm:$0xff] %vm346_vm2, %v393_v19  ;;  %640 = vst.msk [vmem:[%s1259_s12 + $0x8] sm:$0xff] %vm346_vm2, %v388_v20  ;;  %s1303_s11 = scalar_lea.hbm %s1361_s4, %s1204_s30  ;;  %s1297_s22 = int_to_ptr.vmem [resolvable:$true] %s461_s22 }
 0x1d7   : > { %s894_s5 = scalar_lea.vmem %s1297_s22, 512  ;;  %s1008_s26 = smov [#allocation10]  }
 0x1d8   : > { %p895_p9 = scmp.ne.s32.totalorder %s1297_s22, %s894_s5  ;;  %s898_s7 = sshll.u32 %s1008_s26, 4  ;;  %s899_s7 = int_to_ptr.vmem [resolvable:$false] %s898_s7 }
 0x1d9   : > { %v398_v21 = vpop.permute.xlu0 %397  ;;  %s900_s23 = scalar_lea.vmem %s899_s7, 1024  ;;  %p901_p7 = scmp.lt.s32.totalorder %s1297_s22, %s899_s7 }
 0x1da   : > { %642 = vst.msk [vmem:[%s1259_s12 + $0x18] sm:$0xff] %vm346_vm2, %v398_v21  ;;  %p896_p1 = pnand %p895_p9, %p1128_p10  ;;  %p902_p3 = scmp.lt.s32.totalorder %s900_s23, %s894_s5 }
 0x1dc   : > { %p897_p2 = pneg %p896_p1  ;;  %p903_p4 = por %p902_p3, %p901_p7 }
 0x1de   : > { %p904_p13 = pnand %p903_p4, %p897_p2 }
 0x1e0   : > { %907 = shalt.err (!%p904_p13)
}
 0x1e1   : > { %s908_s30 = scalar_lea.hbm %s1303_s11, 512  ;;  %s912_s25 = scalar_lea.hbm %s1361_s4, 1024 }
 0x1e2   : > { %p909_p6 = scmp.ne.s32.totalorder %s1303_s11, %s908_s30  ;;  %p913_p11 = scmp.lt.u32.totalorder %s1303_s11, %s1361_s4 }
 0x1e3   : > { %p914_p0 = scmp.lt.u32.totalorder %s912_s25, %s908_s30  ;;  %p916_p9 = scmp.lt.u32.totalorder %s908_s30, %s1303_s11 }
 0x1e4   : > { %p910_p8 = pnand %p909_p6, %p1128_p10 }
 0x1e5   : > { %p915_p5 = por %p914_p0, %p913_p11 }
 0x1e6   : > { %p911_p12 = pneg %p910_p8 }
 0x1e7   : > { %p917_p1 = por %p916_p9, %p915_p5 }
 0x1e9   : > { %p918_p2 = pnand %p917_p1, %p911_p12 }
 0x1eb   : > { %921 = shalt.err (!%p918_p2)
}
 0x1ec   : > { %687 = dma.vmem_to_hbm [thread:$0]  (%p1128_p10), %s1297_s22, 512, %s1303_s11, %s1218_s18, %s1005_s21, %s1005_s21, %s1006_s10  }
 0x1ed PF: > { %s476_s27 = sand.u32 1, %s964_s15   ;;  %p1378_p7 = scmp.ne.s32.totalorder %s1367_s24, 0 }
 0x1ee   : > { %p1379_p3 = scmp.ge.s32.totalorder %s984_s20, 2  ;;  %s477_s28 = scalar_lea.sflag [#allocation4], %s476_s27 }
 0x1f0   : > { %p700_p4 = pnand %p1379_p3, %p1378_p7 }
 0x1f2   : > { %955 = dma.done.wait (!%p700_p4), %s477_s28, 512  }
 0x1f3   : > { %957 = vsyncadd (!%p700_p4), %s477_s28, 4294966784  ;;  %s1380_s6 = sadd.s32 4294967294, %s984_s20  }
 0x1f4   : > { %s485_s5 = sand.u32 1, %s1380_s6  }
 0x1f5   : > { %s486_s26 = scalar_lea.sflag [#allocation9], %s485_s5 }
 0x1f6   : > { %959 = dma.done.wait (!%p700_p4), %s486_s26, 1024  }
 0x1f7   : > { %961 = vsyncadd (!%p700_p4), %s486_s26, 4294966272  ;;  %s25_s20 = sadd.s32 1, %s984_s20   ;;  %s1381_s15 = smov %s968_s16 }
 0x1f8   : > { %p22_p10 = scmp.ge.s32.totalorder %s25_s20, 4   ;;  %s1382_s16 = smov %s972_s17 }
 0x1f9   : > { %s1383_s17 = smov %s1137_s8  ;;  %s1384_s18 = smov %s980_s19 }
 0x1fa   : > { %s1385_s19 = smov %s1387_s29  ;;  %24 = sbr.rel (!%p22_p10) target bundleno = 9 (0x9), region = 118 }
 0x201   :  { %500 = vsyncpa [#allocation3], 1 }
 0x202   :  { %502 = vsyncpa [#allocation3 + $0x1], 1 }
 0x203   :  { %503 = vsyncpa [#allocation6], 1 }
 0x204   :  { %504 = vsyncpa [#allocation4], 1 }
 0x205   :  { %506 = vsyncpa [#allocation4 + $0x1], 1 }
 0x206   :  { %507 = vsyncpa [#allocation9], 1 }
 0x207   :  { %509 = vsyncpa [#allocation9 + $0x1], 1 }

</bundles_post_ra>
